<compile_context>
chip_gen: v7x
topology: tpu7x:2x2x1
jax: 0.10.0
libtpu: 0.0.40
codegen_flags: <defaults>
</compile_context>

<pallas_src>
import jax
import jax.numpy as jnp
import numpy as np
from jax.experimental import pallas as pl
from jax.experimental.pallas import tpu as pltpu


# ---------------------------------------------------------------------------
# Pallas kernel: one row block of nodes.
#   adj_ref: (TM, N)   normalized adjacency row block
#   h_ref:   (N, F*Cout)  linearly-projected features, flattened (resident)
#   b_ref:   (1, F*Cout)  bias tiled per feature batch (resident)
#   o_ref:   (TM, F*Cout)
# ---------------------------------------------------------------------------
def _aggregate_kernel(adj_ref, h_ref, b_ref, o_ref):
    y = jnp.dot(adj_ref[...], h_ref[...],
                preferred_element_type=jnp.float32)          # MXU, K = N
    o_ref[...] = (y + b_ref[...]).astype(o_ref.dtype)        # VPU epilogue


def _pick_row_tile(n):
    """Largest convenient row tile: full N if small, else a multiple of 8."""
    if n <= 512:
        return n
    for tm in (512, 256, 128, 64, 32, 16, 8):
        if n % tm == 0:
            return tm
    return 256  # cdiv grid; partial last block rows are masked on store


def feature_batch_spatial_graph_conv(x_nfc, adj_norm, weight_io, bias,
                                     row_tile=None):
    """x_nfc: [N, F, Cin] (PyTorch layout). Returns [N, F, Cout]."""
    N, F, Cin = x_nfc.shape
    Cout = weight_io.shape[1]
    FC = F * Cout

    # Tiny Linear (contraction depth = Cin) hoisted to XLA: keeps the kernel's
    # MXU work to a single well-shaped (TM, N) @ (N, F*Cout) matmul.
    h = jnp.einsum("nfi,io->nfo", x_nfc, weight_io)          # [N, F, Cout]
    h_flat = h.reshape(N, FC).astype(x_nfc.dtype)            # contiguous, no transpose

    # bias broadcast over the last dim of [N, F, Cout]  ==  tile(bias, F) in flat layout
    bias_flat = jnp.tile(bias.astype(jnp.float32), F).reshape(1, FC)

    tm = row_tile if row_tile is not None else _pick_row_tile(N)
    grid_m = pl.cdiv(N, tm)

    cost = pl.CostEstimate(
        flops=2 * N * N * FC,
        transcendentals=0,
        bytes_accessed=(N * N + 2 * N * FC) * adj_norm.dtype.itemsize,
    )

    out_flat = pl.pallas_call(
        _aggregate_kernel,
        out_shape=jax.ShapeDtypeStruct((N, FC), x_nfc.dtype),
        grid=(grid_m,),
        in_specs=[
            pl.BlockSpec((tm, N), lambda i: (i, 0)),    # adjacency row block
            pl.BlockSpec((N, FC), lambda i: (0, 0)),    # H (resident, constant map)
            pl.BlockSpec((1, FC), lambda i: (0, 0)),    # bias (resident)
        ],
        out_specs=pl.BlockSpec((tm, FC), lambda i: (i, 0)),
        compiler_params=pltpu.CompilerParams(
            dimension_semantics=("parallel",)),
        cost_estimate=cost,
    )(adj_norm, h_flat, bias_flat)

    return out_flat.reshape(N, F, Cout)


# ---------------------------------------------------------------------------
# Glue: build normalized dense adjacency (mirrors adj() + gcn_norm)
# ---------------------------------------------------------------------------
def build_adj_norm(edge_index, num_nodes, normalize=True, add_self_loops=True):
    src, dst = edge_index[0], edge_index[1]
    rows = jnp.concatenate([src, dst])                    # symmetrize
    cols = jnp.concatenate([dst, src])
    adj = jnp.zeros((num_nodes, num_nodes), jnp.float32).at[rows, cols].add(1.0)
    if add_self_loops:
        eye = jnp.eye(num_nodes, dtype=bool)              # fill_diag: SET to 1
        adj = jnp.where(eye, 1.0, adj)
    if normalize:
        deg = adj.sum(axis=1)
        dis = jnp.where(deg > 0, jax.lax.rsqrt(deg), 0.0)
        adj = adj * dis[:, None] * dis[None, :]
    return adj


# ---------------------------------------------------------------------------
# Pure-JAX reference (mirrors the PyTorch forward exactly)
# ---------------------------------------------------------------------------
def ref_forward(x_nfc, adj_norm, weight_io, bias):
    N, F, Cin = x_nfc.shape
    h = jnp.einsum("nfi,io->nfo", x_nfc, weight_io)       # self.lin(x)
    hf = h.reshape(N, -1)                                 # .view(N, -1)
    y = adj_norm @ hf                                     # adj_norm @ x
    y = y.reshape(N, F, -1) + bias                        # view + bias
    return y


if __name__ == "__main__":
    key = jax.random.PRNGKey(0)
    k_x, k_e, k_w, k_b = jax.random.split(key, 4)

    num_nodes, feat_batch, in_channels, out_channels = 16, 8, 4, 8
    num_edges = 32

    x = jax.random.normal(k_x, (num_nodes, feat_batch, in_channels),
                          dtype=jnp.float32)
    edge_index = jax.random.randint(k_e, (2, num_edges), 0, num_nodes,
                                    dtype=jnp.int32)

    limit = 1.0 / np.sqrt(in_channels)
    weight_io = jax.random.uniform(k_w, (in_channels, out_channels),
                                   minval=-limit, maxval=limit,
                                   dtype=jnp.float32)      # == W.T in torch
    # nonzero bias to exercise the bias-add path (torch init is zeros)
    bias = 0.1 * jax.random.normal(k_b, (out_channels,), dtype=jnp.float32)

    adj_norm = build_adj_norm(edge_index, num_nodes,
                              normalize=True, add_self_loops=True)

    # row_tile=8 -> grid of 2 row blocks, exercising the tiled/pipelined path.
    out = feature_batch_spatial_graph_conv(x, adj_norm, weight_io, bias,
                                           row_tile=8)
    out = jax.block_until_ready(out)

    ref = ref_forward(x, adj_norm, weight_io, bias)
    np.testing.assert_allclose(np.asarray(out), np.asarray(ref),
                               rtol=1e-5, atol=1e-5)

    print("KERNEL_OK")
</pallas_src>

<mosaic_0001>
module attributes {stable_mosaic.version = 11 : i64} {
  func.func @_aggregate_kernel(%arg0: i32, %arg1: memref<8x16xf32, #tpu.memory_space<vmem>>, %arg2: memref<16x64xf32, #tpu.memory_space<vmem>>, %arg3: memref<1x64xf32, #tpu.memory_space<vmem>>, %arg4: memref<8x64xf32, #tpu.memory_space<vmem>>) attributes {dimension_semantics = [#tpu.dimension_semantics<parallel>], iteration_bounds = array<i64: 2>, scalar_prefetch = 0 : i64, scratch_operands = 0 : i64, tpu.core_type = #tpu.core_type<tc>, window_params = [{transform_indices = @transform_0, window_bounds = array<i64: 8, 16>}, {pipeline_mode = #tpu.pipeline_mode<synchronous>, transform_indices = @transform_1, window_bounds = array<i64: 16, 64>}, {pipeline_mode = #tpu.pipeline_mode<synchronous>, transform_indices = @transform_2, window_bounds = array<i64: 1, 64>}, {transform_indices = @transform_3, window_bounds = array<i64: 8, 64>}]} {
    %c0 = arith.constant 0 : index
    %c0_0 = arith.constant 0 : index
    %0 = vector.load %arg1[%c0, %c0_0] : memref<8x16xf32, #tpu.memory_space<vmem>>, vector<8x16xf32>
    %c0_1 = arith.constant 0 : index
    %c0_2 = arith.constant 0 : index
    %1 = vector.load %arg2[%c0_1, %c0_2] : memref<16x64xf32, #tpu.memory_space<vmem>>, vector<16x64xf32>
    %cst = arith.constant dense<0.000000e+00> : vector<8x64xf32>
    %2 = tpu.matmul %0, %1, %cst {dimension_numbers = #tpu.dot_dimension_numbers<[1], [0], [0], [1], [0, 0, 1, 1], [], []>} : vector<8x16xf32>, vector<16x64xf32>, vector<8x64xf32> -> vector<8x64xf32>
    %c0_3 = arith.constant 0 : index
    %c0_4 = arith.constant 0 : index
    %3 = vector.load %arg3[%c0_3, %c0_4] : memref<1x64xf32, #tpu.memory_space<vmem>>, vector<1x64xf32>
    %4 = vector.broadcast %3 : vector<1x64xf32> to vector<8x64xf32>
    %5 = arith.addf %2, %4 : vector<8x64xf32>
    %c0_5 = arith.constant 0 : index
    %c0_6 = arith.constant 0 : index
    %6 = vector.load %arg4[%c0_5, %c0_6] : memref<8x64xf32, #tpu.memory_space<vmem>>, vector<8x64xf32>
    tpu.vector_store %arg4[%c0_5, %c0_6], %5 {strides = array<i32>} : memref<8x64xf32, #tpu.memory_space<vmem>>, vector<8x64xf32>,
    return
  }
  func.func @transform_0(%arg0: i32) -> (i32, i32) {
    %c0_i32 = arith.constant 0 : i32
    %c0_i32_0 = arith.constant 0 : i32
    return %arg0, %c0_i32 : i32, i32
  }
  func.func @transform_1(%arg0: i32) -> (i32, i32) {
    %c0_i32 = arith.constant 0 : i32
    %c0_i32_0 = arith.constant 0 : i32
    %c0_i32_1 = arith.constant 0 : i32
    return %c0_i32, %c0_i32_0 : i32, i32
  }
  func.func @transform_2(%arg0: i32) -> (i32, i32) {
    %c0_i32 = arith.constant 0 : i32
    %c0_i32_0 = arith.constant 0 : i32
    %c0_i32_1 = arith.constant 0 : i32
    return %c0_i32, %c0_i32_0 : i32, i32
  }
  func.func @transform_3(%arg0: i32) -> (i32, i32) {
    %c0_i32 = arith.constant 0 : i32
    %c0_i32_0 = arith.constant 0 : i32
    return %arg0, %c0_i32 : i32, i32
  }
}

</mosaic_0001>

<bundles_post_ra>
// kernel: tpu_custom_call.1
= control target key start
LH: loop header
LB: loop body
LE: loop exit
PB: predicated region body
PF: predicated region fallthrough
CT: control target
= control target key end

     0   :  { %8 = vsyncpa [#allocation3], 0  ;;  %s829_s0 = inlined_call_operand.hbm [shape: f32[16,16], index: 0, kind: input, shape index: {}]   ;;  %s830_s1 = inlined_call_operand.hbm [shape: f32[16,64], index: 1, kind: input, shape index: {}]   ;;  %s831_s2 = inlined_call_operand.vmem [shape: f32[1,64], index: 2, kind: input, shape index: {}]   ;;  %s832_s3 = inlined_call_operand.hbm [shape: f32[16,64], index: 3, kind: output, shape index: {}]  }
   0x1   :  { %10 = vsyncpa [#allocation3 + $0x1], 0 }
   0x2   :  { %11 = vsyncpa [#allocation6], 0 }
   0x3   :  { %12 = vsyncpa [#allocation4], 0 }
   0x4   :  { %14 = vsyncpa [#allocation4 + $0x1], 0  ;;  %s630_s12 = smov 0   ;;  %s632_s13 = smov 0  }
   0x5   :  { %s634_s14 = smov 0   ;;  %s636_s15 = smov 0  }
   0x6 LB: > { %s651_s16 = sadd.s32 4294967295, %s600_s15   ;;  %s381_s17 = sadd.s32 4294967294, %s600_s15   ;;  %s600_s15 = sphi %s636_s15, %s852_s15   ;;  %s596_s14 = sphi %s634_s14, %s851_s14   ;;  %s592_s13 = sphi %s632_s13, %s850_s13   ;;  %s588_s12 = sphi %s630_s12, %s849_s12  }
   0x7   : > { %p40_p0 = scmp.ne.s32.totalorder %s592_s13, %s588_s12  ;;  %p833_p1 = scmp.eq.s32.totalorder %s651_s16, 0 }
   0x8   : > { %p112_p3 = scmp.eq.s32.totalorder %s381_s17, 1  ;;  %p382_p5 = scmp.ge.s32.totalorder %s600_s15, 1 }
   0x9   : > { %p660_p4 = por %p833_p1, %p40_p0  ;;  %p119_p7 = scmp.lt.s32.totalorder %s600_s15, 3 }
   0xa   : > { %p665_p6 = por %p112_p3, %p40_p0  ;;  %s602_s21 = smov [#allocation5]  }
   0xb   : > { %s836_s18 = scalar_select %p660_p4, 1, 0 }
   0xc   : > { %s837_s19 = scalar_select %p665_p6, 1, 0 }
   0xd   : > { %p670_p8 = pnand %p382_p5, %p119_p7  ;;  %s131_s22 = sshll.u32 %s602_s21, 4  ;;  %s674_s22 = int_to_ptr.vmem [resolvable:$true] %s131_s22 }
   0xe   : > { %s686_s24 = sadd.s32 1, %s600_s15   ;;  %s27_s25 = sadd.s32 1, %s596_s14 }
   0xf   : > { %s838_s20 = scalar_select %p670_p8, 1, 0 }
  0x10   : > { %p418_p9 = pneg %p670_p8  ;;  %s24_s26 = ssub.s32 %s600_s15, %s686_s24 }
  0x11   : > { %s472_s29 = scalar_lea.hbm %s830_s1, 256 }
  0x12   : > { %p681_p11 = pnand %p418_p9, %p833_p1  ;;  %p473_p12 = scmp.ne.s32.totalorder %s830_s1, %s472_s29 }
  0x13   : > { %p479_p5 = scmp.lt.u32.totalorder %s472_s29, %s830_s1 }
  0x14   : > { %p474_p13 = pneg %p681_p11 }
  0x16   : > { %p475_p0 = pnand %p474_p13, %p473_p12 }
  0x18   : > { %p476_p3 = pneg %p475_p0 }
  0x1a   : > { %p481_p7 = pnand %p479_p5, %p476_p3 }
  0x1c   : > { %484 = shalt.err (!%p481_p7)
}
  0x1d   : > { %s485_s7 = scalar_lea.vmem %s674_s22, 256  ;;  %p493_p2 = scmp.lt.s32.totalorder %s674_s22, %s674_s22 }
  0x1e   : > { %p486_p9 = scmp.ne.s32.totalorder %s674_s22, %s485_s7  ;;  %p494_p6 = scmp.lt.s32.totalorder %s485_s7, %s485_s7 }
  0x20   : > { %p488_p10 = pnand %p486_p9, %p474_p13  ;;  %p495_p4 = por %p494_p6, %p493_p2 }
  0x22   : > { %p489_p1 = pneg %p488_p10 }
  0x24   : > { %p496_p8 = pnand %p495_p4, %p489_p1 }
  0x26   : > { %499 = shalt.err (!%p496_p8)
}
  0x27   : > { %s603_s8 = smov 128   ;;  %s604_s9 = smov 8  }
  0x28   : > { %421 = dma.hbm_to_vmem [thread:$0]  (!%p681_p11), %s830_s1, 256, %s674_s22, [#allocation6], %s603_s8, %s603_s8, %s604_s9  }
  0x29   : > { %p25_p2 = scmp.eq.s32.totalorder %s24_s26, 0  ;;  %p34_p1 = scmp.ne.s32.totalorder %s596_s14, %s592_s13 }
  0x2a   : > { %p35_p4 = scmp.eq.s32.totalorder %s600_s15, 0  ;;  %p431_p6 = scmp.lt.s32.totalorder %s600_s15, 2 }
  0x2b   : > { %s717_s17 = scalar_select %p25_p2, %s596_s14, %s27_s25  }
  0x2c   : > { %p36_p8 = por %p35_p4, %p34_p1  ;;  %p840_p10 = scmp.eq.s32.totalorder %s651_s16, 1 }
  0x2d   : > { %s148_s27 = sand.u32 1, %s596_s14   ;;  %s386_s28 = sshll.u32 %s600_s15, 7 }
  0x2e   : > { %p721_p12 = por %p840_p10, %p34_p1  ;;  %s385_s29 = sshll.u32 %s148_s27, 3 }
  0x2f   : > { %s730_s4 = scalar_lea.hbm %s829_s0, %s386_s28  ;;  %s152_s22 = scalar_lea.vmem [#allocation2], %s385_s29 }
  0x30   : > { %s159_s25 = sshll.u32 %s152_s22, 4  ;;  %p732_p11 = pnand %p431_p6, %p36_p8  ;;  %s736_s25 = int_to_ptr.vmem [resolvable:$true] %s159_s25 }
  0x31   : > { %s149_s5 = scalar_lea.sflag [#allocation3], %s148_s27  ;;  %s500_s6 = scalar_lea.hbm %s730_s4, 128 }
  0x32   : > { %p501_p13 = scmp.ne.s32.totalorder %s730_s4, %s500_s6  ;;  %p502_p0 = pneg %p732_p11 }
  0x33   : > { %s505_s9 = scalar_lea.hbm %s829_s0, 256  ;;  %p506_p7 = scmp.lt.u32.totalorder %s730_s4, %s829_s0 }
  0x34   : > { %p503_p3 = pnand %p502_p0, %p501_p13  ;;  %p507_p9 = scmp.lt.u32.totalorder %s505_s9, %s500_s6 }
  0x35   : > { %p509_p1 = scmp.lt.u32.totalorder %s500_s6, %s730_s4 }
  0x36   : > { %p504_p5 = pneg %p503_p3  ;;  %p508_p2 = por %p507_p9, %p506_p7 }
  0x38   : > { %p510_p4 = por %p509_p1, %p508_p2 }
  0x3a   : > { %p511_p6 = pnand %p510_p4, %p504_p5 }
  0x3c   : > { %514 = shalt.err (!%p511_p6)
}
  0x3d   : > { %s515_s27 = scalar_lea.vmem %s736_s25, 128  ;;  %s605_s28 = smov [#allocation2]  }
  0x3e   : > { %p516_p8 = scmp.ne.s32.totalorder %s736_s25, %s515_s27  ;;  %s520_s29 = sshll.u32 %s605_s28, 4  ;;  %s521_s29 = int_to_ptr.vmem [resolvable:$false] %s520_s29 }
  0x3f   : > { %s522_s23 = scalar_lea.vmem %s521_s29, 256  ;;  %p523_p3 = scmp.lt.s32.totalorder %s736_s25, %s521_s29 }
  0x40   : > { %p518_p10 = pnand %p516_p8, %p502_p0  ;;  %p524_p7 = scmp.lt.s32.totalorder %s522_s23, %s515_s27 }
  0x42   : > { %p519_p13 = pneg %p518_p10  ;;  %p525_p9 = por %p524_p7, %p523_p3 }
  0x44   : > { %p526_p2 = pnand %p525_p9, %p519_p13 }
  0x46   : > { %529 = shalt.err (!%p526_p2)
}
  0x47   : > { %425 = dma.hbm_to_vmem [thread:$0]  (!%p732_p11), %s730_s4, 128, %s736_s25, %s149_s5  }
  0x48   : > { %p843_p5 = scmp.ne.s32.totalorder %s838_s20, 0 }
  0x49   : > { %s766_s30 = sand.u32 (!%p843_p5), 1, %s592_s13   ;;  %p844_p0 = scmp.ne.s32.totalorder (!%p843_p5), %s836_s18, 0 }
  0x4a   : > { %168 = sbr.rel (%p843_p5) target bundleno = 319 (0x13f), region = 32  ;;  %s388_s22 = sshll.u32 (!%p843_p5), %s766_s30, 3 }
  0x4b   : > { %s171_s6 = scalar_lea.sflag (!%p843_p5), [#allocation3], %s766_s30  ;;  %s174_s7 = scalar_lea.vmem (!%p843_p5), [#allocation2], %s388_s22 }
  0x51   : > { %575 = dma.done.wait (%p844_p0), %s171_s6, 128  }
  0x52   : > { %577 = vsyncadd (%p844_p0), %s171_s6, 4294967168  ;;  %p845_p1 = scmp.eq.s32.totalorder %s651_s16, 0 }
  0x54   : > { %579 = dma.done.wait (%p845_p1), [#allocation6], 256   ;;  %p846_p11 = pmov %p845_p1 }
  0x55   : > { %v606_v0 = vmov 0.0|0.0   ;;  %vm607_vm0 = vmmov 0   ;;  %v608_v1 = vmov 0.0   ;;  %v202_v2 = vld [vmem:[#allocation5] sm:$0xff]  ;;  %v203_v3 = vld [vmem:[#allocation5 + $0x8] sm:$0xff]  ;;  %v201_v5 = vld [vmem:[%s174_s7] sm:$0xff] }
  0x56   : > { %581 = vsyncadd (%p846_p11), [#allocation6], 4294967040  ;;  %407 = vmatprep.subr.bf16.mxu0 %v606_v0  ;;  %404 = vmatprep.mubr.msk.f32.mxu0 %vm607_vm0, %v608_v1  ;;  %v408_v4 = vpack.c.bf16 %v203_v3, %v202_v2  ;;  %vm211_vm1 = vcmask 130048   ;;  %v391_v6 = vld [vmem:[%s831_s2] ss:$0 sm:$0xff]  ;;  %s394_s4 = sshll.u32 %s651_s16, 7 }
  0x57   : > { %s200_s25 = scalar_lea.vmem [#allocation7], %s388_s22  ;;  %vm285_vm2 = vcmask 523264   ;;  %s785_s9 = scalar_lea.hbm %s832_s3, %s394_s4 }
  0x58   : > { %409 = vmatpush3.bf16.msra.mxu0 %v408_v4  ;;  %s301_s26 = sshll.u32 %s200_s25, 4  ;;  %s288_s10 = scalar_lea.sflag [#allocation4], %s766_s30  ;;  %s787_s26 = int_to_ptr.vmem [resolvable:$true] %s301_s26 }
  0x59   : > { %s530_s11 = scalar_lea.vmem %s787_s26, 128  ;;  %s609_s16 = smov [#allocation7]  }
  0x5a   : > { %p531_p4 = scmp.ne.s32.totalorder %s787_s26, %s530_s11  ;;  %s534_s27 = sshll.u32 %s609_s16, 4  ;;  %s535_s27 = int_to_ptr.vmem [resolvable:$false] %s534_s27 }
  0x5b   : > { %405 = vmatmul.mubr.msk.f32.vlgmr.msra.gmra.mrb[0].mxu0 %vm211_vm1, %v201_v5  ;;  %s536_s28 = scalar_lea.vmem %s535_s27, 256  ;;  %p537_p10 = scmp.lt.s32.totalorder %s787_s26, %s535_s27 }
  0x5c   : > { %p532_p6 = pnand %p531_p4, %p721_p12  ;;  %p538_p13 = scmp.lt.s32.totalorder %s536_s28, %s530_s11 }
  0x5e   : > { %p533_p8 = pneg %p532_p6  ;;  %p539_p3 = por %p538_p13, %p537_p10 }
  0x60   : > { %p540_p7 = pnand %p539_p3, %p533_p8 }
 0x12e   : > { %v281_v7 = vpop.f32.mrb[0].mxu0 }
 0x12f   : > { %v282_v8 = vadd.f32 %v391_v6, %v281_v7  ;;  %v406_v9 = vpop.f32.mrb[1].mxu0 }
 0x131   : > { %286 = vst.msk [vmem:[%s200_s25] sm:$0xff] %vm285_vm2, %v282_v8 }
 0x132   : > { %543 = shalt.err (!%p540_p7)
}
 0x133   : > { %s544_s29 = scalar_lea.hbm %s785_s9, 128  ;;  %s548_s22 = scalar_lea.hbm %s832_s3, 256 }
 0x134   : > { %p545_p9 = scmp.ne.s32.totalorder %s785_s9, %s544_s29  ;;  %p549_p0 = scmp.lt.u32.totalorder %s785_s9, %s832_s3 }
 0x135   : > { %p550_p1 = scmp.lt.u32.totalorder %s548_s22, %s544_s29  ;;  %p552_p4 = scmp.lt.u32.totalorder %s544_s29, %s785_s9 }
 0x136   : > { %p546_p2 = pnand %p545_p9, %p721_p12 }
 0x137   : > { %p551_p11 = por %p550_p1, %p549_p0 }
 0x138   : > { %p547_p5 = pneg %p546_p2 }
 0x139   : > { %p553_p6 = por %p552_p4, %p551_p11 }
 0x13b   : > { %p554_p8 = pnand %p553_p6, %p547_p5 }
 0x13d   : > { %557 = shalt.err (!%p554_p8)
}
 0x13e   : > { %416 = dma.vmem_to_hbm [thread:$0]  (%p721_p12), %s787_s26, 128, %s785_s9, %s288_s10  }
 0x13f PF: > { %s313_s18 = sand.u32 1, %s588_s12   ;;  %p847_p10 = scmp.ne.s32.totalorder %s837_s19, 0 }
 0x140   : > { %p848_p13 = scmp.ge.s32.totalorder %s600_s15, 2  ;;  %s314_s20 = scalar_lea.sflag [#allocation4], %s313_s18 }
 0x142   : > { %p427_p3 = pnand %p848_p13, %p847_p10 }
 0x144   : > { %583 = dma.done.wait (!%p427_p3), %s314_s20, 128  }
 0x145   : > { %585 = vsyncadd (!%p427_p3), %s314_s20, 4294967168  ;;  %p17_p7 = scmp.ge.s32.totalorder %s686_s24, 4   ;;  %s849_s12 = smov %s592_s13 }
 0x146   : > { %s850_s13 = smov %s596_s14  ;;  %s851_s14 = smov %s717_s17 }
 0x147   : > { %s852_s15 = smov %s686_s24  ;;  %19 = sbr.rel (!%p17_p7) target bundleno = 6 (0x6), region = 81 }
 0x14e   :  { %319 = vsyncpa [#allocation3], 1 }
 0x14f   :  { %321 = vsyncpa [#allocation3 + $0x1], 1 }
 0x150   :  { %322 = vsyncpa [#allocation6], 1 }
 0x151   :  { %323 = vsyncpa [#allocation4], 1 }
 0x152   :  { %325 = vsyncpa [#allocation4 + $0x1], 1 }

</bundles_post_ra>
